<compile_context>
chip_gen: v7x
topology: tpu7x:2x2x1
jax: 0.10.0
libtpu: 0.0.40
codegen_flags: <defaults>
</compile_context>

<pallas_src>
import functools

import jax
import jax.numpy as jnp
from jax.experimental import pallas as pl
from jax.experimental.pallas import tpu as pltpu


def _round_up(x: int, m: int) -> int:
    return ((x + m - 1) // m) * m


def _cdiv(a: int, b: int) -> int:
    return (a + b - 1) // b


def _choose_tiles(batch: int):
    """Pick (TM, B_P, n_tiles): TM multiple of 16, <= 1024 rows, small overpad,
    and >= 2 grid steps when batch >= 32 (v7x megacore)."""
    b16 = _round_up(max(batch, 1), 16)
    n_tiles = _cdiv(b16, 1024)
    if b16 >= 32:
        n_tiles = max(n_tiles, 2)
    tm = _round_up(_cdiv(b16, n_tiles), 16)
    b_pad = n_tiles * tm
    return tm, b_pad, n_tiles


def mlp_kernel(x_ref, w1_ref, b1_ref, w2_ref, b2_ref, o_ref):
    # Cast the f32 activation tile to bf16 in-register (no extra HBM traffic).
    x_bf = x_ref[...].astype(jnp.bfloat16)
    # lin1: (TM, 784) bf16 @ (784, 512) bf16 -> f32 accumulate
    a1 = jnp.dot(x_bf, w1_ref[...], preferred_element_type=jnp.float32)
    a1 = a1 + b1_ref[...]                      # f32 bias add
    a2 = jnp.maximum(a1, 0.0)                  # f32 ReLU
    # lin2: (TM, 512) bf16 @ (512, 128) bf16 -> f32 accumulate
    a3 = jnp.dot(a2.astype(jnp.bfloat16), w2_ref[...],
                 preferred_element_type=jnp.float32)
    o_ref[...] = (a3 + b2_ref[...]).astype(o_ref.dtype)   # bf16, lane-dense store


def prepare_params(w1, b1, w2, b2):
    """One-time pad+cast of the parameters (call once at init, reuse every forward)."""
    IN, HID = w1.shape
    OUT = w2.shape[1]
    HID_P = _round_up(HID, 128)   # 500 -> 512 (lane-aligned hidden / K dim)
    OUT_P = _round_up(OUT, 128)   # 10  -> 128 (lane-dense output stores)

    w1_p = jnp.zeros((IN, HID_P), jnp.bfloat16).at[:, :HID].set(w1.astype(jnp.bfloat16))
    b1_p = jnp.zeros((1, HID_P), jnp.float32).at[0, :HID].set(b1.astype(jnp.float32))
    w2_p = jnp.zeros((HID_P, OUT_P), jnp.bfloat16).at[:HID, :OUT].set(w2.astype(jnp.bfloat16))
    b2_p = jnp.zeros((1, OUT_P), jnp.float32).at[0, :OUT].set(b2.astype(jnp.float32))
    return (w1_p, b1_p, w2_p, b2_p), OUT


@functools.partial(jax.jit, static_argnames=("num_out",))
def mnist_logreg_forward(x, params, num_out):
    """x: (B, 784) f32; params: output of prepare_params(); returns (B, num_out) f32."""
    w1_p, b1_p, w2_p, b2_p = params
    B, IN = x.shape
    HID_P = w1_p.shape[1]
    OUT_P = w2_p.shape[1]

    TM, B_P, n_tiles = _choose_tiles(B)

    x_p = x.astype(jnp.float32)
    if B_P != B:
        # Small batch pad (at most n_tiles*16-ish rows); padded rows are sliced off below.
        x_p = jnp.zeros((B_P, IN), jnp.float32).at[:B, :].set(x_p)

    cost = pl.CostEstimate(
        flops=2 * B_P * (IN * HID_P + HID_P * OUT_P),
        transcendentals=0,
        bytes_accessed=(x_p.size * 4 + w1_p.size * 2 + w2_p.size * 2
                        + b1_p.size * 4 + b2_p.size * 4 + B_P * OUT_P * 2),
    )

    out_p = pl.pallas_call(
        mlp_kernel,
        out_shape=jax.ShapeDtypeStruct((B_P, OUT_P), jnp.bfloat16),
        grid=(n_tiles,),
        in_specs=[
            pl.BlockSpec((TM, IN), lambda i: (i, 0)),        # x tile (f32), pipelined
            pl.BlockSpec((IN, HID_P), lambda i: (0, 0)),     # w1 (bf16), VMEM-resident
            pl.BlockSpec((1, HID_P), lambda i: (0, 0)),      # b1 (f32), resident
            pl.BlockSpec((HID_P, OUT_P), lambda i: (0, 0)),  # w2 (bf16), resident
            pl.BlockSpec((1, OUT_P), lambda i: (0, 0)),      # b2 (f32), resident
        ],
        out_specs=pl.BlockSpec((TM, OUT_P), lambda i: (i, 0)),
        compiler_params=pltpu.CompilerParams(
            dimension_semantics=("parallel",),               # v7x: shard batch over 2 TCs
        ),
        cost_estimate=cost,
    )(x_p, w1_p, b1_p, w2_p, b2_p)

    return out_p[:B, :num_out].astype(jnp.float32)


def reference_forward(x, w1, b1, w2, b2):
    a1 = x @ w1 + b1
    a2 = jnp.maximum(a1, 0.0)
    return a2 @ w2 + b2


if __name__ == "__main__":
    key = jax.random.PRNGKey(0)
    k_x, k_w1, k_b1, k_w2, k_b2 = jax.random.split(key, 5)

    B = 8
    IN, HID, OUT = 784, 500, 10

    # Deterministic parameter init mimicking nn.Linear default (uniform +/- 1/sqrt(fan_in)).
    x = jax.random.normal(k_x, (B, IN), dtype=jnp.float32)
    bound1 = 1.0 / jnp.sqrt(IN)
    w1 = jax.random.uniform(k_w1, (IN, HID), minval=-bound1, maxval=bound1, dtype=jnp.float32)
    b1 = jax.random.uniform(k_b1, (HID,), minval=-bound1, maxval=bound1, dtype=jnp.float32)
    bound2 = 1.0 / jnp.sqrt(HID)
    w2 = jax.random.uniform(k_w2, (HID, OUT), minval=-bound2, maxval=bound2, dtype=jnp.float32)
    b2 = jax.random.uniform(k_b2, (OUT,), minval=-bound2, maxval=bound2, dtype=jnp.float32)

    # One-time parameter preparation (pad + bf16 cast), hoisted out of the forward path.
    params, num_out = prepare_params(w1, b1, w2, b2)
    params = jax.block_until_ready(params)

    out = mnist_logreg_forward(x, params, num_out)
    out = jax.block_until_ready(out)

    ref = reference_forward(x, w1, b1, w2, b2)
    assert out.shape == (B, OUT)
    # bf16 matmul inputs / bf16 output store with f32 accumulation: loosened tolerance
    # vs the pure-f32 reference (intentional, documented tradeoff).
    assert jnp.allclose(out, ref, atol=4e-2, rtol=4e-2)

    print("KERNEL_OK")
</pallas_src>

<mosaic_0001>
module attributes {stable_mosaic.version = 11 : i64} {
  func.func @mlp_kernel(%arg0: i32, %arg1: memref<16x784xf32, #tpu.memory_space<vmem>>, %arg2: memref<784x512xbf16, #tpu.memory_space<vmem>>, %arg3: memref<1x512xf32, #tpu.memory_space<vmem>>, %arg4: memref<512x128xbf16, #tpu.memory_space<vmem>>, %arg5: memref<1x128xf32, #tpu.memory_space<vmem>>, %arg6: memref<16x128xbf16, #tpu.memory_space<vmem>>) attributes {dimension_semantics = [#tpu.dimension_semantics<parallel>], iteration_bounds = array<i64: 1>, scalar_prefetch = 0 : i64, scratch_operands = 0 : i64, tpu.core_type = #tpu.core_type<tc>, window_params = [{transform_indices = @transform_0, window_bounds = array<i64: 16, 784>}, {pipeline_mode = #tpu.pipeline_mode<synchronous>, transform_indices = @transform_1, window_bounds = array<i64: 784, 512>}, {pipeline_mode = #tpu.pipeline_mode<synchronous>, transform_indices = @transform_2, window_bounds = array<i64: 1, 512>}, {pipeline_mode = #tpu.pipeline_mode<synchronous>, transform_indices = @transform_3, window_bounds = array<i64: 512, 128>}, {pipeline_mode = #tpu.pipeline_mode<synchronous>, transform_indices = @transform_4, window_bounds = array<i64: 1, 128>}, {transform_indices = @transform_5, window_bounds = array<i64: 16, 128>}]} {
    %c0 = arith.constant 0 : index
    %c0_0 = arith.constant 0 : index
    %0 = vector.load %arg1[%c0, %c0_0] : memref<16x784xf32, #tpu.memory_space<vmem>>, vector<16x784xf32>
    %1 = arith.truncf %0 : vector<16x784xf32> to vector<16x784xbf16>
    %c0_1 = arith.constant 0 : index
    %c0_2 = arith.constant 0 : index
    %2 = vector.load %arg2[%c0_1, %c0_2] : memref<784x512xbf16, #tpu.memory_space<vmem>>, vector<784x512xbf16>
    %cst = arith.constant dense<0.000000e+00> : vector<16x512xf32>
    %3 = tpu.matmul %1, %2, %cst {dimension_numbers = #tpu.dot_dimension_numbers<[1], [0], [0], [1], [0, 0, 1, 1], [], []>} : vector<16x784xbf16>, vector<784x512xbf16>, vector<16x512xf32> -> vector<16x512xf32>
    %c0_3 = arith.constant 0 : index
    %c0_4 = arith.constant 0 : index
    %4 = vector.load %arg3[%c0_3, %c0_4] : memref<1x512xf32, #tpu.memory_space<vmem>>, vector<1x512xf32>
    %5 = vector.broadcast %4 : vector<1x512xf32> to vector<16x512xf32>
    %6 = arith.addf %3, %5 : vector<16x512xf32>
    %cst_5 = arith.constant 0.000000e+00 : f32
    %7 = vector.broadcast %cst_5 : f32 to vector<16x512xf32>
    %8 = arith.maximumf %6, %7 : vector<16x512xf32>
    %9 = arith.truncf %8 : vector<16x512xf32> to vector<16x512xbf16>
    %c0_6 = arith.constant 0 : index
    %c0_7 = arith.constant 0 : index
    %10 = vector.load %arg4[%c0_6, %c0_7] : memref<512x128xbf16, #tpu.memory_space<vmem>>, vector<512x128xbf16>
    %cst_8 = arith.constant dense<0.000000e+00> : vector<16x128xf32>
    %11 = tpu.matmul %9, %10, %cst_8 {dimension_numbers = #tpu.dot_dimension_numbers<[1], [0], [0], [1], [0, 0, 1, 1], [], []>} : vector<16x512xbf16>, vector<512x128xbf16>, vector<16x128xf32> -> vector<16x128xf32>
    %c0_9 = arith.constant 0 : index
    %c0_10 = arith.constant 0 : index
    %12 = vector.load %arg5[%c0_9, %c0_10] : memref<1x128xf32, #tpu.memory_space<vmem>>, vector<1x128xf32>
    %13 = vector.broadcast %12 : vector<1x128xf32> to vector<16x128xf32>
    %14 = arith.addf %11, %13 : vector<16x128xf32>
    %15 = arith.truncf %14 : vector<16x128xf32> to vector<16x128xbf16>
    %c0_11 = arith.constant 0 : index
    %c0_12 = arith.constant 0 : index
    %16 = vector.load %arg6[%c0_11, %c0_12] : memref<16x128xbf16, #tpu.memory_space<vmem>>, vector<16x128xbf16>
    tpu.vector_store %arg6[%c0_11, %c0_12], %15 {strides = array<i32>} : memref<16x128xbf16, #tpu.memory_space<vmem>>, vector<16x128xbf16>,
    return
  }
  func.func @transform_0(%arg0: i32) -> (i32, i32) {
    %c0_i32 = arith.constant 0 : i32
    %c0_i32_0 = arith.constant 0 : i32
    return %arg0, %c0_i32 : i32, i32
  }
  func.func @transform_1(%arg0: i32) -> (i32, i32) {
    %c0_i32 = arith.constant 0 : i32
    %c0_i32_0 = arith.constant 0 : i32
    %c0_i32_1 = arith.constant 0 : i32
    return %c0_i32, %c0_i32_0 : i32, i32
  }
  func.func @transform_2(%arg0: i32) -> (i32, i32) {
    %c0_i32 = arith.constant 0 : i32
    %c0_i32_0 = arith.constant 0 : i32
    %c0_i32_1 = arith.constant 0 : i32
    return %c0_i32, %c0_i32_0 : i32, i32
  }
  func.func @transform_3(%arg0: i32) -> (i32, i32) {
    %c0_i32 = arith.constant 0 : i32
    %c0_i32_0 = arith.constant 0 : i32
    %c0_i32_1 = arith.constant 0 : i32
    return %c0_i32, %c0_i32_0 : i32, i32
  }
  func.func @transform_4(%arg0: i32) -> (i32, i32) {
    %c0_i32 = arith.constant 0 : i32
    %c0_i32_0 = arith.constant 0 : i32
    %c0_i32_1 = arith.constant 0 : i32
    return %c0_i32, %c0_i32_0 : i32, i32
  }
  func.func @transform_5(%arg0: i32) -> (i32, i32) {
    %c0_i32 = arith.constant 0 : i32
    %c0_i32_0 = arith.constant 0 : i32
    return %arg0, %c0_i32 : i32, i32
  }
}

</mosaic_0001>

<bundles_post_ra>
// kernel: mnist_logreg_forward.1
= control target key start
LH: loop header
LB: loop body
LE: loop exit
PB: predicated region body
PF: predicated region fallthrough
CT: control target
= control target key end

     0   :  { %10 = vsyncpa [#allocation3], 0  ;;  %s2798_s0 = inlined_call_operand.vmem [shape: f32[16,784], index: 0, kind: input, shape index: {}]   ;;  %s2799_s1 = inlined_call_operand.hbm [shape: bf16[784,512], index: 1, kind: input, shape index: {}]   ;;  %s2800_s2 = inlined_call_operand.vmem [shape: f32[1,512], index: 2, kind: input, shape index: {}]   ;;  %s2801_s3 = inlined_call_operand.hbm [shape: bf16[512,128], index: 3, kind: input, shape index: {}]   ;;  %s2802_s4 = inlined_call_operand.vmem [shape: f32[1,128], index: 4, kind: input, shape index: {}]   ;;  %s2803_s5 = inlined_call_operand.vmem [shape: bf16[16,128], index: 5, kind: output, shape index: {}]  }
   0x1   :  { %11 = vsyncpa [#allocation5], 0  ;;  %s2686_s18 = smov [#allocation2]   ;;  %s2638_s22 = scalar_lea.hbm %s2799_s1, 25088 }
   0x2   :  { %s19_s19 = sshll.u32 %s2686_s18, 4  ;;  %p2639_p0 = scmp.ne.s32.totalorder %s2799_s1, %s2638_s22  ;;  %s20_s19 = int_to_ptr.vmem [resolvable:$true] %s19_s19 }
   0x3   :  { %p2642_p1 = scmp.lt.u32.totalorder %s2638_s22, %s2799_s1 }
   0x5   :  { %p2644_p2 = pnand %p2642_p1, %p2639_p0 }
   0x7   :  { %2647 = shalt.err (!%p2644_p2)
}
   0x8   :  { %s2648_s27 = scalar_lea.vmem %s20_s19, 25088  ;;  %p2653_p4 = scmp.lt.s32.totalorder %s20_s19, %s20_s19 }
   0x9   :  { %p2649_p3 = scmp.ne.s32.totalorder %s20_s19, %s2648_s27  ;;  %p2654_p5 = scmp.lt.s32.totalorder %s2648_s27, %s2648_s27 }
   0xb   :  { %p2655_p6 = por %p2654_p5, %p2653_p4 }
   0xd   :  { %p2656_p7 = pnand %p2655_p6, %p2649_p3 }
   0xf   :  { %2659 = shalt.err (!%p2656_p7)
}
  0x10   :  { %s2687_s28 = smov 256   ;;  %s2688_s29 = smov 16  }
  0x11   :  { %25 = dma.hbm_to_vmem [thread:$0]  %s2799_s1, 25088, %s20_s19, [#allocation3], %s2687_s28, %s2687_s28, %s2688_s29  }
  0x12   :  { %s2689_s7 = smov [#allocation4]   ;;  %s2660_s11 = scalar_lea.hbm %s2801_s3, 4096 }
  0x13   :  { %s33_s8 = sshll.u32 %s2689_s7, 4  ;;  %p2661_p8 = scmp.ne.s32.totalorder %s2801_s3, %s2660_s11  ;;  %s34_s8 = int_to_ptr.vmem [resolvable:$true] %s33_s8 }
  0x14   :  { %p2664_p9 = scmp.lt.u32.totalorder %s2660_s11, %s2801_s3 }
  0x16   :  { %p2666_p10 = pnand %p2664_p9, %p2661_p8 }
  0x18   :  { %2669 = shalt.err (!%p2666_p10)
}
  0x19   :  { %s2670_s16 = scalar_lea.vmem %s34_s8, 4096  ;;  %p2675_p12 = scmp.lt.s32.totalorder %s34_s8, %s34_s8 }
  0x1a   :  { %p2671_p11 = scmp.ne.s32.totalorder %s34_s8, %s2670_s16  ;;  %p2676_p13 = scmp.lt.s32.totalorder %s2670_s16, %s2670_s16 }
  0x1c   :  { %p2677_p0 = por %p2676_p13, %p2675_p12 }
  0x1e   :  { %p2678_p1 = pnand %p2677_p0, %p2671_p11 }
  0x20   :  { %2681 = shalt.err (!%p2678_p1)
}
  0x21   :  { %s2690_s1 = smov 64   ;;  %s2691_s17 = smov 4  }
  0x22   :  { %39 = dma.hbm_to_vmem [thread:$0]  %s2801_s3, 4096, %s34_s8, [#allocation5], %s2690_s1, %s2690_s1, %s2691_s17  }
  0x23   :  { %2682 = dma.done.wait [#allocation3], 25088  }
  0x24   :  { %2683 = vsyncadd [#allocation3], 4294942208 }
  0x25   :  { %2684 = dma.done.wait [#allocation5], 4096  }
  0x26   :  { %2685 = vsyncadd [#allocation5], 4294963200  ;;  %v2312_v0 = vld [vmem:[#allocation2 + $0x4] ss:$16 sps:$4 sm:$0xff]   ;;  %v2314_v1 = vld [vmem:[#allocation2 + $0xc] ss:$16 sps:$4 sm:$0xff]  }
  0x27   :  { %1272 = vmatprep.subr.bf16.mxu0 %v2312_v0  ;;  %v2316_v2 = vld [vmem:[#allocation2] ss:$16 sps:$4 sm:$0xff]   ;;  %v2317_v3 = vld [vmem:[#allocation2 + $0x8] ss:$16 sps:$4 sm:$0xff]   ;;  %1444 = vmatprep.subr.bf16.mxu1 %v2314_v1  ;;  %v2318_v4 = vld [vmem:[#allocation2 + $0x24] ss:$16 sps:$4 sm:$0xff]  }
  0x28   :  { %1273 = vmatpush1.bf16.msra.mxu0 %v2316_v2  ;;  %1445 = vmatpush1.bf16.msra.mxu1 %v2317_v3  ;;  %v2320_v5 = vld [vmem:[#allocation2 + $0x2c] ss:$16 sps:$4 sm:$0xff]   ;;  %v2322_v6 = vld [vmem:[#allocation2 + $0x20] ss:$16 sps:$4 sm:$0xff]   ;;  %v2323_v7 = vld [vmem:[#allocation2 + $0x28] ss:$16 sps:$4 sm:$0xff]  }
  0x29   :  { %1274 = vmatprep.subr.bf16.mxu0 %v2318_v4  ;;  %1446 = vmatprep.subr.bf16.mxu1 %v2320_v5  ;;  %v2324_v8 = vld [vmem:[#allocation2 + $0x44] ss:$16 sps:$4 sm:$0xff]   ;;  %v2326_v9 = vld [vmem:[#allocation2 + $0x4c] ss:$16 sps:$4 sm:$0xff]   ;;  %v2328_v10 = vld [vmem:[#allocation2 + $0x40] ss:$16 sps:$4 sm:$0xff]  }
  0x2a   :  { %v2329_v11 = vld [vmem:[#allocation2 + $0x48] ss:$16 sps:$4 sm:$0xff]   ;;  %v2330_v12 = vld [vmem:[#allocation2 + $0x64] ss:$16 sps:$4 sm:$0xff]   ;;  %v2332_v13 = vld [vmem:[#allocation2 + $0x6c] ss:$16 sps:$4 sm:$0xff]  }
  0x2b   :  { %v2334_v14 = vld [vmem:[#allocation2 + $0x60] ss:$16 sps:$4 sm:$0xff]   ;;  %v2335_v15 = vld [vmem:[#allocation2 + $0x68] ss:$16 sps:$4 sm:$0xff]   ;;  %v2336_v16 = vld [vmem:[#allocation2 + $0x84] ss:$16 sps:$4 sm:$0xff]  }
  0x2c   :  { %1275 = vmatpush1.bf16.msra.mxu0 %v2322_v6  ;;  %1447 = vmatpush1.bf16.msra.mxu1 %v2323_v7  ;;  %v2338_v17 = vld [vmem:[#allocation2 + $0x8c] ss:$16 sps:$4 sm:$0xff]   ;;  %v2340_v18 = vld [vmem:[#allocation2 + $0x80] ss:$16 sps:$4 sm:$0xff]   ;;  %v2341_v19 = vld [vmem:[#allocation2 + $0x88] ss:$16 sps:$4 sm:$0xff]  }
  0x2d   :  { %1276 = vmatprep.subr.bf16.mxu0 %v2324_v8  ;;  %1448 = vmatprep.subr.bf16.mxu1 %v2326_v9  ;;  %v2342_v20 = vld [vmem:[#allocation2 + $0xa4] ss:$16 sps:$4 sm:$0xff]   ;;  %v2344_v21 = vld [vmem:[#allocation2 + $0xac] ss:$16 sps:$4 sm:$0xff]   ;;  %v2346_v22 = vld [vmem:[#allocation2 + $0xa0] ss:$16 sps:$4 sm:$0xff]  }
  0x2e   :  { %v2347_v23 = vld [vmem:[#allocation2 + $0xa8] ss:$16 sps:$4 sm:$0xff]   ;;  %v2348_v24 = vld [vmem:[#allocation2 + $0xc4] ss:$16 sps:$4 sm:$0xff]   ;;  %v2350_v25 = vld [vmem:[#allocation2 + $0xcc] ss:$16 sps:$4 sm:$0xff]  }
  0x2f   :  { %v2352_v26 = vld [vmem:[#allocation2 + $0xc0] ss:$16 sps:$4 sm:$0xff]   ;;  %v2353_v27 = vld [vmem:[#allocation2 + $0xc8] ss:$16 sps:$4 sm:$0xff]   ;;  %v2354_v28 = vld [vmem:[#allocation2 + $0xe4] ss:$16 sps:$4 sm:$0xff]  }
  0x30   :  { %1277 = vmatpush1.bf16.msra.mxu0 %v2328_v10  ;;  %1449 = vmatpush1.bf16.msra.mxu1 %v2329_v11  ;;  %v2356_v29 = vld [vmem:[#allocation2 + $0xec] ss:$16 sps:$4 sm:$0xff]   ;;  %v2358_v30 = vld [vmem:[#allocation2 + $0xe0] ss:$16 sps:$4 sm:$0xff]   ;;  %v2359_v31 = vld [vmem:[#allocation2 + $0xe8] ss:$16 sps:$4 sm:$0xff]  }
  0x31   :  { %1278 = vmatprep.subr.bf16.mxu0 %v2330_v12  ;;  %1450 = vmatprep.subr.bf16.mxu1 %v2332_v13  ;;  %v2360_v32 = vld [vmem:[#allocation2 + $0x104] ss:$16 sps:$4 sm:$0xff]   ;;  %v2362_v33 = vld [vmem:[#allocation2 + $0x10c] ss:$16 sps:$4 sm:$0xff]   ;;  %v2364_v34 = vld [vmem:[#allocation2 + $0x100] ss:$16 sps:$4 sm:$0xff]  }
  0x32   :  { %v2365_v35 = vld [vmem:[#allocation2 + $0x108] ss:$16 sps:$4 sm:$0xff]   ;;  %v2366_v36 = vld [vmem:[#allocation2 + $0x124] ss:$16 sps:$4 sm:$0xff]   ;;  %v2368_v37 = vld [vmem:[#allocation2 + $0x12c] ss:$16 sps:$4 sm:$0xff]  }
  0x33   :  { %v2370_v38 = vld [vmem:[#allocation2 + $0x120] ss:$16 sps:$4 sm:$0xff]   ;;  %v2371_v39 = vld [vmem:[#allocation2 + $0x128] ss:$16 sps:$4 sm:$0xff]   ;;  %v2372_v40 = vld [vmem:[#allocation2 + $0x144] ss:$16 sps:$4 sm:$0xff]  }
  0x34   :  { %1279 = vmatpush1.bf16.msra.mxu0 %v2334_v14  ;;  %1451 = vmatpush1.bf16.msra.mxu1 %v2335_v15  ;;  %v2374_v41 = vld [vmem:[#allocation2 + $0x14c] ss:$16 sps:$4 sm:$0xff]   ;;  %v2376_v42 = vld [vmem:[#allocation2 + $0x140] ss:$16 sps:$4 sm:$0xff]   ;;  %v2377_v43 = vld [vmem:[#allocation2 + $0x148] ss:$16 sps:$4 sm:$0xff]  }
  0x35   :  { %1280 = vmatprep.subr.bf16.mxu0 %v2336_v16  ;;  %1452 = vmatprep.subr.bf16.mxu1 %v2338_v17  ;;  %v2378_v44 = vld [vmem:[#allocation2 + $0x164] ss:$16 sps:$4 sm:$0xff]   ;;  %v2380_v45 = vld [vmem:[#allocation2 + $0x16c] ss:$16 sps:$4 sm:$0xff]   ;;  %v2382_v48 = vld [vmem:[#allocation2 + $0x160] ss:$16 sps:$4 sm:$0xff]  }
  0x36   :  { %v50_v46 = vld [vmem:[%s2798_s0 + $0x8] sm:$0xff]  ;;  %v57_v47 = vld [vmem:[%s2798_s0 + $0x40] sm:$0xff]  ;;  %v56_v5 = vld [vmem:[%s2798_s0 + $0x38] sm:$0xff]  ;;  %vm1268_vm0 = vcmask 130048  }
  0x37   :  { %v2383_v49 = vld [vmem:[#allocation2 + $0x168] ss:$16 sps:$4 sm:$0xff]   ;;  %v64_v50 = vpack.c.bf16 %v57_v47, %v50_v46  ;;  %v2384_v51 = vld [vmem:[#allocation2 + $0x184] ss:$16 sps:$4 sm:$0xff]   ;;  %v2386_v52 = vld [vmem:[#allocation2 + $0x18c] ss:$16 sps:$4 sm:$0xff]  }
  0x38   :  { %1281 = vmatpush1.bf16.msra.mxu0 %v2340_v18  ;;  %1453 = vmatpush1.bf16.msra.mxu1 %v2341_v19  ;;  %v2388_v53 = vld [vmem:[#allocation2 + $0x180] ss:$16 sps:$4 sm:$0xff]   ;;  %v2389_v54 = vld [vmem:[#allocation2 + $0x188] ss:$16 sps:$4 sm:$0xff]   ;;  %v2390_v55 = vld [vmem:[#allocation2 + $0x1a4] ss:$16 sps:$4 sm:$0xff]  }
  0x39   :  { %1282 = vmatprep.subr.bf16.mxu0 %v2342_v20  ;;  %1454 = vmatprep.subr.bf16.mxu1 %v2344_v21  ;;  %v2392_v56 = vld [vmem:[#allocation2 + $0x1ac] ss:$16 sps:$4 sm:$0xff]   ;;  %v2394_v57 = vld [vmem:[#allocation2 + $0x1a0] ss:$16 sps:$4 sm:$0xff]   ;;  %v2395_v58 = vld [vmem:[#allocation2 + $0x1a8] ss:$16 sps:$4 sm:$0xff]  }
  0x3a   :  { %1304 = vmatprep.mubr.bf16.mxu0 %v64_v50  ;;  %1476 = vmatprep.mubr.bf16.mxu1 %v64_v50  ;;  %v2396_v59 = vld [vmem:[#allocation2 + $0x1c4] ss:$16 sps:$4 sm:$0xff]   ;;  %v2398_v60 = vld [vmem:[#allocation2 + $0x1cc] ss:$16 sps:$4 sm:$0xff]   ;;  %v2400_v61 = vld [vmem:[#allocation2 + $0x1c0] ss:$16 sps:$4 sm:$0xff]  }
  0x3b   :  { %v2401_v62 = vld [vmem:[#allocation2 + $0x1c8] ss:$16 sps:$4 sm:$0xff]   ;;  %v2402_v63 = vld [vmem:[#allocation2 + $0x1e4] ss:$16 sps:$4 sm:$0xff]   ;;  %v2404_v0 = vld [vmem:[#allocation2 + $0x1ec] ss:$16 sps:$4 sm:$0xff]  }
  0x3c   :  { %1283 = vmatpush1.bf16.msra.mxu0 %v2346_v22  ;;  %1455 = vmatpush1.bf16.msra.mxu1 %v2347_v23  ;;  %v2406_v1 = vld [vmem:[#allocation2 + $0x1e0] ss:$16 sps:$4 sm:$0xff]   ;;  %v2407_v2 = vld [vmem:[#allocation2 + $0x1e8] ss:$16 sps:$4 sm:$0xff]   ;;  %v2410_v3 = vld [vmem:[#allocation2 + $0x204] ss:$16 sps:$4 sm:$0xff]  }
  0x3d   :  { %1284 = vmatprep.subr.bf16.mxu0 %v2348_v24  ;;  %1456 = vmatprep.subr.bf16.mxu1 %v2350_v25  ;;  %v49_v4 = vld [vmem:[%s2798_s0] sm:$0xff]  ;;  %v2413_v6 = vld [vmem:[#allocation2 + $0x20c] ss:$16 sps:$4 sm:$0xff]   ;;  %v2411_v8 = vld [vmem:[#allocation2 + $0x208] ss:$16 sps:$4 sm:$0xff]  }
  0x3e   :  { %v2408_v7 = vld [vmem:[#allocation2 + $0x200] ss:$16 sps:$4 sm:$0xff]   ;;  %v63_v9 = vpack.c.bf16 %v56_v5, %v49_v4  ;;  %v2416_v10 = vld [vmem:[#allocation2 + $0x224] ss:$16 sps:$4 sm:$0xff]   ;;  %v2419_v11 = vld [vmem:[#allocation2 + $0x22c] ss:$16 sps:$4 sm:$0xff]  }
  0x3f   :  { %v2414_v12 = vld [vmem:[#allocation2 + $0x220] ss:$16 sps:$4 sm:$0xff]   ;;  %v2417_v13 = vld [vmem:[#allocation2 + $0x228] ss:$16 sps:$4 sm:$0xff]   ;;  %v2422_v14 = vld [vmem:[#allocation2 + $0x244] ss:$16 sps:$4 sm:$0xff]  }
  0x40   :  { %1285 = vmatpush1.bf16.msra.mxu0 %v2352_v26  ;;  %1457 = vmatpush1.bf16.msra.mxu1 %v2353_v27  ;;  %v2425_v15 = vld [vmem:[#allocation2 + $0x24c] ss:$16 sps:$4 sm:$0xff]   ;;  %v2420_v16 = vld [vmem:[#allocation2 + $0x240] ss:$16 sps:$4 sm:$0xff]   ;;  %v2423_v17 = vld [vmem:[#allocation2 + $0x248] ss:$16 sps:$4 sm:$0xff]  }
  0x41   :  { %1286 = vmatprep.subr.bf16.mxu0 %v2354_v28  ;;  %1458 = vmatprep.subr.bf16.mxu1 %v2356_v29  ;;  %v2428_v18 = vld [vmem:[#allocation2 + $0x264] ss:$16 sps:$4 sm:$0xff]   ;;  %v2431_v19 = vld [vmem:[#allocation2 + $0x26c] ss:$16 sps:$4 sm:$0xff]   ;;  %v2426_v20 = vld [vmem:[#allocation2 + $0x260] ss:$16 sps:$4 sm:$0xff]  }
  0x42   :  { %v2429_v21 = vld [vmem:[#allocation2 + $0x268] ss:$16 sps:$4 sm:$0xff]   ;;  %v2434_v22 = vld [vmem:[#allocation2 + $0x284] ss:$16 sps:$4 sm:$0xff]   ;;  %v2437_v23 = vld [vmem:[#allocation2 + $0x28c] ss:$16 sps:$4 sm:$0xff]  }
  0x43   :  { %v2432_v24 = vld [vmem:[#allocation2 + $0x280] ss:$16 sps:$4 sm:$0xff]   ;;  %v2435_v25 = vld [vmem:[#allocation2 + $0x288] ss:$16 sps:$4 sm:$0xff]   ;;  %v2440_v26 = vld [vmem:[#allocation2 + $0x2a4] ss:$16 sps:$4 sm:$0xff]  }
  0x44   :  { %1287 = vmatpush1.bf16.msra.mxu0 %v2358_v30  ;;  %1459 = vmatpush1.bf16.msra.mxu1 %v2359_v31  ;;  %v2443_v27 = vld [vmem:[#allocation2 + $0x2ac] ss:$16 sps:$4 sm:$0xff]   ;;  %v2438_v28 = vld [vmem:[#allocation2 + $0x2a0] ss:$16 sps:$4 sm:$0xff]   ;;  %v2441_v29 = vld [vmem:[#allocation2 + $0x2a8] ss:$16 sps:$4 sm:$0xff]  }
  0x45   :  { %1288 = vmatprep.subr.bf16.mxu0 %v2360_v32  ;;  %1460 = vmatprep.subr.bf16.mxu1 %v2362_v33  ;;  %v2446_v30 = vld [vmem:[#allocation2 + $0x2c4] ss:$16 sps:$4 sm:$0xff]   ;;  %v2449_v31 = vld [vmem:[#allocation2 + $0x2cc] ss:$16 sps:$4 sm:$0xff]   ;;  %v2462_v47 = vld [vmem:[#allocation2 + $0x320] ss:$16 sps:$4 sm:$0xff]  }
  0x46   :  { %v52_v32 = vld [vmem:[%s2798_s0 + $0x18] sm:$0xff]  ;;  %v59_v33 = vld [vmem:[%s2798_s0 + $0x50] sm:$0xff] }
  0x47   :  { %v2467_v46 = vld [vmem:[#allocation2 + $0x32c] ss:$16 sps:$4 sm:$0xff]   ;;  %v2495_v4 = vld [vmem:[#allocation2 + $0x3c8] ss:$16 sps:$4 sm:$0xff]   ;;  %v2500_v5 = vld [vmem:[#allocation2 + $0x3e4] ss:$16 sps:$4 sm:$0xff]  }
  0x48   :  { %1289 = vmatpush1.bf16.msra.mxu0 %v2364_v34  ;;  %1461 = vmatpush1.bf16.msra.mxu1 %v2365_v35  ;;  %v2444_v34 = vld [vmem:[#allocation2 + $0x2c0] ss:$16 sps:$4 sm:$0xff]   ;;  %v2447_v35 = vld [vmem:[#allocation2 + $0x2c8] ss:$16 sps:$4 sm:$0xff]   ;;  %v2473_v50 = vld [vmem:[#allocation2 + $0x34c] ss:$16 sps:$4 sm:$0xff]  }
  0x49   :  { %1290 = vmatprep.subr.bf16.mxu0 %v2366_v36  ;;  %1462 = vmatprep.subr.bf16.mxu1 %v2368_v37  ;;  %v66_v36 = vpack.c.bf16 %v59_v33, %v52_v32  ;;  %v2452_v37 = vld [vmem:[#allocation2 + $0x2e4] ss:$16 sps:$4 sm:$0xff]   ;;  %v2533_v32 = vld [vmem:[#allocation2 + $0x48c] ss:$16 sps:$4 sm:$0xff]   ;;  %v2528_v33 = vld [vmem:[#allocation2 + $0x480] ss:$16 sps:$4 sm:$0xff]  }
  0x4c   :  { %1291 = vmatpush1.bf16.msra.mxu0 %v2370_v38  ;;  %1463 = vmatpush1.bf16.msra.mxu1 %v2371_v39  ;;  %v2455_v38 = vld [vmem:[#allocation2 + $0x2ec] ss:$16 sps:$4 sm:$0xff]   ;;  %v2450_v39 = vld [vmem:[#allocation2 + $0x2e0] ss:$16 sps:$4 sm:$0xff]  }
  0x4d   :  { %1292 = vmatprep.subr.bf16.mxu0 %v2372_v40  ;;  %1464 = vmatprep.subr.bf16.mxu1 %v2374_v41  ;;  %v2453_v40 = vld [vmem:[#allocation2 + $0x2e8] ss:$16 sps:$4 sm:$0xff]   ;;  %v2458_v41 = vld [vmem:[#allocation2 + $0x304] ss:$16 sps:$4 sm:$0xff]  }
  0x50   :  { %1293 = vmatpush1.bf16.msra.mxu0 %v2376_v42  ;;  %1465 = vmatpush1.bf16.msra.mxu1 %v2377_v43  ;;  %v2461_v42 = vld [vmem:[#allocation2 + $0x30c] ss:$16 sps:$4 sm:$0xff]   ;;  %v2456_v43 = vld [vmem:[#allocation2 + $0x300] ss:$16 sps:$4 sm:$0xff]  }
  0x51   :  { %1294 = vmatprep.subr.bf16.mxu0 %v2378_v44  ;;  %1466 = vmatprep.subr.bf16.mxu1 %v2380_v45  ;;  %v2459_v44 = vld [vmem:[#allocation2 + $0x308] ss:$16 sps:$4 sm:$0xff]   ;;  %v2464_v45 = vld [vmem:[#allocation2 + $0x324] ss:$16 sps:$4 sm:$0xff]  }
  0x54   :  { %1295 = vmatpush1.bf16.msra.mxu0 %v2382_v48  ;;  %1467 = vmatpush1.bf16.msra.mxu1 %v2383_v49  ;;  %v2465_v48 = vld [vmem:[#allocation2 + $0x328] ss:$16 sps:$4 sm:$0xff]   ;;  %v2470_v49 = vld [vmem:[#allocation2 + $0x344] ss:$16 sps:$4 sm:$0xff]  }
  0x55   :  { %1296 = vmatprep.subr.bf16.mxu0 %v2384_v51  ;;  %1468 = vmatprep.subr.bf16.mxu1 %v2386_v52  ;;  %v2468_v51 = vld [vmem:[#allocation2 + $0x340] ss:$16 sps:$4 sm:$0xff]   ;;  %v2471_v52 = vld [vmem:[#allocation2 + $0x348] ss:$16 sps:$4 sm:$0xff]  }
  0x58   :  { %1297 = vmatpush1.bf16.msra.mxu0 %v2388_v53  ;;  %1469 = vmatpush1.bf16.msra.mxu1 %v2389_v54  ;;  %v2476_v53 = vld [vmem:[#allocation2 + $0x364] ss:$16 sps:$4 sm:$0xff]   ;;  %v2479_v54 = vld [vmem:[#allocation2 + $0x36c] ss:$16 sps:$4 sm:$0xff]  }
  0x59   :  { %1298 = vmatprep.subr.bf16.mxu0 %v2390_v55  ;;  %1470 = vmatprep.subr.bf16.mxu1 %v2392_v56  ;;  %v2474_v55 = vld [vmem:[#allocation2 + $0x360] ss:$16 sps:$4 sm:$0xff]   ;;  %v2477_v56 = vld [vmem:[#allocation2 + $0x368] ss:$16 sps:$4 sm:$0xff]  }
  0x5c   :  { %1299 = vmatpush1.bf16.msra.mxu0 %v2394_v57  ;;  %1471 = vmatpush1.bf16.msra.mxu1 %v2395_v58  ;;  %v2482_v57 = vld [vmem:[#allocation2 + $0x384] ss:$16 sps:$4 sm:$0xff]   ;;  %v2485_v58 = vld [vmem:[#allocation2 + $0x38c] ss:$16 sps:$4 sm:$0xff]  }
  0x5d   :  { %1300 = vmatprep.subr.bf16.mxu0 %v2396_v59  ;;  %1472 = vmatprep.subr.bf16.mxu1 %v2398_v60  ;;  %v2480_v59 = vld [vmem:[#allocation2 + $0x380] ss:$16 sps:$4 sm:$0xff]   ;;  %v2483_v60 = vld [vmem:[#allocation2 + $0x388] ss:$16 sps:$4 sm:$0xff]  }
  0x60   :  { %1301 = vmatpush1.bf16.msra.mxu0 %v2400_v61  ;;  %1473 = vmatpush1.bf16.msra.mxu1 %v2401_v62  ;;  %v2488_v61 = vld [vmem:[#allocation2 + $0x3a4] ss:$16 sps:$4 sm:$0xff]   ;;  %v2491_v62 = vld [vmem:[#allocation2 + $0x3ac] ss:$16 sps:$4 sm:$0xff]  }
  0x61   :  { %1302 = vmatprep.subr.bf16.mxu0 %v2402_v63  ;;  %1474 = vmatprep.subr.bf16.mxu1 %v2404_v0  ;;  %v2486_v63 = vld [vmem:[#allocation2 + $0x3a0] ss:$16 sps:$4 sm:$0xff]   ;;  %v2489_v0 = vld [vmem:[#allocation2 + $0x3a8] ss:$16 sps:$4 sm:$0xff]  }
  0x64   :  { %1303 = vmatpush1.bf16.msra.mxu0 %v2406_v1  ;;  %1475 = vmatpush1.bf16.msra.mxu1 %v2407_v2  ;;  %v2494_v1 = vld [vmem:[#allocation2 + $0x3c4] ss:$16 sps:$4 sm:$0xff]   ;;  %v2497_v2 = vld [vmem:[#allocation2 + $0x3cc] ss:$16 sps:$4 sm:$0xff]  }
  0x65   :  { %1315 = vmatprep.subr.bf16.mxu0 %v2410_v3  ;;  %1487 = vmatprep.subr.bf16.mxu1 %v2413_v6  ;;  %v2492_v3 = vld [vmem:[#allocation2 + $0x3c0] ss:$16 sps:$4 sm:$0xff]   ;;  %v2503_v6 = vld [vmem:[#allocation2 + $0x3ec] ss:$16 sps:$4 sm:$0xff]  }
  0x67   :  { %1305 = vmatmul.mubr.bf16.vlgmr.msra.gmra.mrb[0].mxu0 %v63_v9  ;;  %1477 = vmatmul.mubr.bf16.vlgmr.msra.gmra.mrb[0].mxu1 %v63_v9  ;;  %v2506_v9 = vld [vmem:[#allocation2 + $0x404] ss:$16 sps:$4 sm:$0xff]  }
  0x68   :  { %1316 = vmatpush1.bf16.msra.mxu0 %v2408_v7  ;;  %1488 = vmatpush1.bf16.msra.mxu1 %v2411_v8  ;;  %v2498_v7 = vld [vmem:[#allocation2 + $0x3e0] ss:$16 sps:$4 sm:$0xff]   ;;  %v2501_v8 = vld [vmem:[#allocation2 + $0x3e8] ss:$16 sps:$4 sm:$0xff]  }
  0x69   :  { %1317 = vmatprep.subr.bf16.mxu0 %v2416_v10  ;;  %1489 = vmatprep.subr.bf16.mxu1 %v2419_v11  ;;  %v51_v10 = vld [vmem:[%s2798_s0 + $0x10] sm:$0xff]  ;;  %v58_v11 = vld [vmem:[%s2798_s0 + $0x48] sm:$0xff] }
  0x6a   :  { %1347 = vmatprep.mubr.bf16.mxu0 %v66_v36  ;;  %1519 = vmatprep.mubr.bf16.mxu1 %v66_v36  ;;  %v2539_v36 = vld [vmem:[#allocation2 + $0x4ac] ss:$16 sps:$4 sm:$0xff]  }
  0x6c   :  { %1318 = vmatpush1.bf16.msra.mxu0 %v2414_v12  ;;  %1490 = vmatpush1.bf16.msra.mxu1 %v2417_v13  ;;  %v2509_v12 = vld [vmem:[#allocation2 + $0x40c] ss:$16 sps:$4 sm:$0xff]   ;;  %v2504_v13 = vld [vmem:[#allocation2 + $0x400] ss:$16 sps:$4 sm:$0xff]  }
  0x6d   :  { %1319 = vmatprep.subr.bf16.mxu0 %v2422_v14  ;;  %1491 = vmatprep.subr.bf16.mxu1 %v2425_v15  ;;  %v2507_v14 = vld [vmem:[#allocation2 + $0x408] ss:$16 sps:$4 sm:$0xff]   ;;  %v65_v15 = vpack.c.bf16 %v58_v11, %v51_v10  ;;  %v2596_v11 = vld [vmem:[#allocation2 + $0x5e4] ss:$16 sps:$4 sm:$0xff]  }
  0x6e   :  { %v2591_v10 = vld [vmem:[#allocation2 + $0x5c8] ss:$16 sps:$4 sm:$0xff]  }
  0x70   :  { %1320 = vmatpush1.bf16.msra.mxu0 %v2420_v16  ;;  %1492 = vmatpush1.bf16.msra.mxu1 %v2423_v17  ;;  %v2512_v16 = vld [vmem:[#allocation2 + $0x424] ss:$16 sps:$4 sm:$0xff]   ;;  %v2515_v17 = vld [vmem:[#allocation2 + $0x42c] ss:$16 sps:$4 sm:$0xff]  }
  0x71   :  { %1321 = vmatprep.subr.bf16.mxu0 %v2428_v18  ;;  %1493 = vmatprep.subr.bf16.mxu1 %v2431_v19  ;;  %v54_v18 = vld [vmem:[%s2798_s0 + $0x28] sm:$0xff]  ;;  %v2510_v19 = vld [vmem:[#allocation2 + $0x420] ss:$16 sps:$4 sm:$0xff]  }
  0x74   :  { %1322 = vmatpush1.bf16.msra.mxu0 %v2426_v20  ;;  %1494 = vmatpush1.bf16.msra.mxu1 %v2429_v21  ;;  %v2513_v20 = vld [vmem:[#allocation2 + $0x428] ss:$16 sps:$4 sm:$0xff]   ;;  %v61_v21 = vld [vmem:[%s2798_s0 + $0x60] sm:$0xff] }
  0x75   :  { %1323 = vmatprep.subr.bf16.mxu0 %v2434_v22  ;;  %1495 = vmatprep.subr.bf16.mxu1 %v2437_v23  ;;  %v2518_v22 = vld [vmem:[#allocation2 + $0x444] ss:$16 sps:$4 sm:$0xff]   ;;  %v68_v23 = vpack.c.bf16 %v61_v21, %v54_v18  ;;  %v2605_v18 = vld [vmem:[#allocation2 + $0x60c] ss:$16 sps:$4 sm:$0xff]   ;;  %v2603_v21 = vld [vmem:[#allocation2 + $0x608] ss:$16 sps:$4 sm:$0xff]  }
  0x78   :  { %1324 = vmatpush1.bf16.msra.mxu0 %v2432_v24  ;;  %1496 = vmatpush1.bf16.msra.mxu1 %v2435_v25  ;;  %v2521_v24 = vld [vmem:[#allocation2 + $0x44c] ss:$16 sps:$4 sm:$0xff]   ;;  %v2516_v25 = vld [vmem:[#allocation2 + $0x440] ss:$16 sps:$4 sm:$0xff]  }
  0x79   :  { %1325 = vmatprep.subr.bf16.mxu0 %v2440_v26  ;;  %1497 = vmatprep.subr.bf16.mxu1 %v2443_v27  ;;  %v2519_v26 = vld [vmem:[#allocation2 + $0x448] ss:$16 sps:$4 sm:$0xff]   ;;  %v2524_v27 = vld [vmem:[#allocation2 + $0x464] ss:$16 sps:$4 sm:$0xff]  }
  0x7c   :  { %1326 = vmatpush1.bf16.msra.mxu0 %v2438_v28  ;;  %1498 = vmatpush1.bf16.msra.mxu1 %v2441_v29  ;;  %v2527_v28 = vld [vmem:[#allocation2 + $0x46c] ss:$16 sps:$4 sm:$0xff]   ;;  %v2522_v29 = vld [vmem:[#allocation2 + $0x460] ss:$16 sps:$4 sm:$0xff]  }
  0x7d   :  { %1327 = vmatprep.subr.bf16.mxu0 %v2446_v30  ;;  %1499 = vmatprep.subr.bf16.mxu1 %v2449_v31  ;;  %v2525_v30 = vld [vmem:[#allocation2 + $0x468] ss:$16 sps:$4 sm:$0xff]   ;;  %v2530_v31 = vld [vmem:[#allocation2 + $0x484] ss:$16 sps:$4 sm:$0xff]  }
  0x80   :  { %1328 = vmatpush1.bf16.msra.mxu0 %v2444_v34  ;;  %1500 = vmatpush1.bf16.msra.mxu1 %v2447_v35  ;;  %v2531_v34 = vld [vmem:[#allocation2 + $0x488] ss:$16 sps:$4 sm:$0xff]   ;;  %v2536_v35 = vld [vmem:[#allocation2 + $0x4a4] ss:$16 sps:$4 sm:$0xff]  }
  0x81   :  { %1329 = vmatprep.subr.bf16.mxu0 %v2452_v37  ;;  %1501 = vmatprep.subr.bf16.mxu1 %v2455_v38  ;;  %v2534_v37 = vld [vmem:[#allocation2 + $0x4a0] ss:$16 sps:$4 sm:$0xff]   ;;  %v2537_v38 = vld [vmem:[#allocation2 + $0x4a8] ss:$16 sps:$4 sm:$0xff]  }
  0x84   :  { %1330 = vmatpush1.bf16.msra.mxu0 %v2450_v39  ;;  %1502 = vmatpush1.bf16.msra.mxu1 %v2453_v40  ;;  %v2542_v39 = vld [vmem:[#allocation2 + $0x4c4] ss:$16 sps:$4 sm:$0xff]   ;;  %v2545_v40 = vld [vmem:[#allocation2 + $0x4cc] ss:$16 sps:$4 sm:$0xff]  }
  0x85   :  { %1331 = vmatprep.subr.bf16.mxu0 %v2458_v41  ;;  %1503 = vmatprep.subr.bf16.mxu1 %v2461_v42  ;;  %v2540_v41 = vld [vmem:[#allocation2 + $0x4c0] ss:$16 sps:$4 sm:$0xff]   ;;  %v2543_v42 = vld [vmem:[#allocation2 + $0x4c8] ss:$16 sps:$4 sm:$0xff]  }
  0x88   :  { %1332 = vmatpush1.bf16.msra.mxu0 %v2456_v43  ;;  %1504 = vmatpush1.bf16.msra.mxu1 %v2459_v44  ;;  %v2548_v43 = vld [vmem:[#allocation2 + $0x4e4] ss:$16 sps:$4 sm:$0xff]   ;;  %v2551_v44 = vld [vmem:[#allocation2 + $0x4ec] ss:$16 sps:$4 sm:$0xff]  }
  0x89   :  { %1333 = vmatprep.subr.bf16.mxu0 %v2464_v45  ;;  %1505 = vmatprep.subr.bf16.mxu1 %v2467_v46  ;;  %v2546_v45 = vld [vmem:[#allocation2 + $0x4e0] ss:$16 sps:$4 sm:$0xff]   ;;  %v2549_v46 = vld [vmem:[#allocation2 + $0x4e8] ss:$16 sps:$4 sm:$0xff]  }
  0x8c   :  { %1334 = vmatpush1.bf16.msra.mxu0 %v2462_v47  ;;  %1506 = vmatpush1.bf16.msra.mxu1 %v2465_v48  ;;  %v2554_v47 = vld [vmem:[#allocation2 + $0x504] ss:$16 sps:$4 sm:$0xff]   ;;  %v2557_v48 = vld [vmem:[#allocation2 + $0x50c] ss:$16 sps:$4 sm:$0xff]  }
  0x8d   :  { %1335 = vmatprep.subr.bf16.mxu0 %v2470_v49  ;;  %1507 = vmatprep.subr.bf16.mxu1 %v2473_v50  ;;  %v2552_v49 = vld [vmem:[#allocation2 + $0x500] ss:$16 sps:$4 sm:$0xff]   ;;  %v2555_v50 = vld [vmem:[#allocation2 + $0x508] ss:$16 sps:$4 sm:$0xff]  }
  0x90   :  { %1336 = vmatpush1.bf16.msra.mxu0 %v2468_v51  ;;  %1508 = vmatpush1.bf16.msra.mxu1 %v2471_v52  ;;  %v2560_v51 = vld [vmem:[#allocation2 + $0x524] ss:$16 sps:$4 sm:$0xff]   ;;  %v2563_v52 = vld [vmem:[#allocation2 + $0x52c] ss:$16 sps:$4 sm:$0xff]  }
  0x91   :  { %1337 = vmatprep.subr.bf16.mxu0 %v2476_v53  ;;  %1509 = vmatprep.subr.bf16.mxu1 %v2479_v54  ;;  %v2558_v53 = vld [vmem:[#allocation2 + $0x520] ss:$16 sps:$4 sm:$0xff]   ;;  %v2561_v54 = vld [vmem:[#allocation2 + $0x528] ss:$16 sps:$4 sm:$0xff]  }
  0x94   :  { %1338 = vmatpush1.bf16.msra.mxu0 %v2474_v55  ;;  %1510 = vmatpush1.bf16.msra.mxu1 %v2477_v56  ;;  %v2566_v55 = vld [vmem:[#allocation2 + $0x544] ss:$16 sps:$4 sm:$0xff]   ;;  %v2569_v56 = vld [vmem:[#allocation2 + $0x54c] ss:$16 sps:$4 sm:$0xff]  }
  0x95   :  { %1339 = vmatprep.subr.bf16.mxu0 %v2482_v57  ;;  %1511 = vmatprep.subr.bf16.mxu1 %v2485_v58  ;;  %v2564_v57 = vld [vmem:[#allocation2 + $0x540] ss:$16 sps:$4 sm:$0xff]   ;;  %v2567_v58 = vld [vmem:[#allocation2 + $0x548] ss:$16 sps:$4 sm:$0xff]  }
  0x98   :  { %1340 = vmatpush1.bf16.msra.mxu0 %v2480_v59  ;;  %1512 = vmatpush1.bf16.msra.mxu1 %v2483_v60  ;;  %v2572_v59 = vld [vmem:[#allocation2 + $0x564] ss:$16 sps:$4 sm:$0xff]   ;;  %v2575_v60 = vld [vmem:[#allocation2 + $0x56c] ss:$16 sps:$4 sm:$0xff]  }
  0x99   :  { %1341 = vmatprep.subr.bf16.mxu0 %v2488_v61  ;;  %1513 = vmatprep.subr.bf16.mxu1 %v2491_v62  ;;  %v2570_v61 = vld [vmem:[#allocation2 + $0x560] ss:$16 sps:$4 sm:$0xff]   ;;  %v2573_v62 = vld [vmem:[#allocation2 + $0x568] ss:$16 sps:$4 sm:$0xff]  }
  0x9c   :  { %1342 = vmatpush1.bf16.msra.mxu0 %v2486_v63  ;;  %1514 = vmatpush1.bf16.msra.mxu1 %v2489_v0  ;;  %v2578_v63 = vld [vmem:[#allocation2 + $0x584] ss:$16 sps:$4 sm:$0xff]   ;;  %v2581_v0 = vld [vmem:[#allocation2 + $0x58c] ss:$16 sps:$4 sm:$0xff]  }
  0x9d   :  { %1343 = vmatprep.subr.bf16.mxu0 %v2494_v1  ;;  %1515 = vmatprep.subr.bf16.mxu1 %v2497_v2  ;;  %v2576_v1 = vld [vmem:[#allocation2 + $0x580] ss:$16 sps:$4 sm:$0xff]   ;;  %v2579_v2 = vld [vmem:[#allocation2 + $0x588] ss:$16 sps:$4 sm:$0xff]  }
  0xa0   :  { %1344 = vmatpush1.bf16.msra.mxu0 %v2492_v3  ;;  %1516 = vmatpush1.bf16.msra.mxu1 %v2495_v4  ;;  %v2584_v3 = vld [vmem:[#allocation2 + $0x5a4] ss:$16 sps:$4 sm:$0xff]   ;;  %v2587_v4 = vld [vmem:[#allocation2 + $0x5ac] ss:$16 sps:$4 sm:$0xff]  }
  0xa1   :  { %1345 = vmatprep.subr.bf16.mxu0 %v2500_v5  ;;  %1517 = vmatprep.subr.bf16.mxu1 %v2503_v6  ;;  %v2582_v5 = vld [vmem:[#allocation2 + $0x5a0] ss:$16 sps:$4 sm:$0xff]   ;;  %v2585_v6 = vld [vmem:[#allocation2 + $0x5a8] ss:$16 sps:$4 sm:$0xff]  }
  0xa4   :  { %1346 = vmatpush1.bf16.msra.mxu0 %v2498_v7  ;;  %1518 = vmatpush1.bf16.msra.mxu1 %v2501_v8  ;;  %v2590_v7 = vld [vmem:[#allocation2 + $0x5c4] ss:$16 sps:$4 sm:$0xff]   ;;  %v2593_v8 = vld [vmem:[#allocation2 + $0x5cc] ss:$16 sps:$4 sm:$0xff]  }
  0xa5   :  { %1358 = vmatprep.subr.bf16.mxu0 %v2506_v9  ;;  %1530 = vmatprep.subr.bf16.mxu1 %v2509_v12  ;;  %v2588_v9 = vld [vmem:[#allocation2 + $0x5c0] ss:$16 sps:$4 sm:$0xff]   ;;  %v2599_v12 = vld [vmem:[#allocation2 + $0x5ec] ss:$16 sps:$4 sm:$0xff]  }
  0xa7   :  { %1348 = vmatmul.mubr.bf16.vlgmr.msra.gmra.mrb[0].mxu0 %v65_v15  ;;  %1520 = vmatmul.mubr.bf16.vlgmr.msra.gmra.mrb[0].mxu1 %v65_v15  ;;  %v53_v15 = vld [vmem:[%s2798_s0 + $0x20] sm:$0xff] }
  0xa8   :  { %1359 = vmatpush1.bf16.msra.mxu0 %v2504_v13  ;;  %1531 = vmatpush1.bf16.msra.mxu1 %v2507_v14  ;;  %v2594_v13 = vld [vmem:[#allocation2 + $0x5e0] ss:$16 sps:$4 sm:$0xff]   ;;  %v2597_v14 = vld [vmem:[#allocation2 + $0x5e8] ss:$16 sps:$4 sm:$0xff]  }
  0xa9   :  { %1360 = vmatprep.subr.bf16.mxu0 %v2512_v16  ;;  %1532 = vmatprep.subr.bf16.mxu1 %v2515_v17  ;;  %v60_v16 = vld [vmem:[%s2798_s0 + $0x58] sm:$0xff]  ;;  %v2602_v17 = vld [vmem:[#allocation2 + $0x604] ss:$16 sps:$4 sm:$0xff]  }
  0xaa   :  { %1390 = vmatprep.mubr.bf16.mxu0 %v68_v23  ;;  %1562 = vmatprep.mubr.bf16.mxu1 %v68_v23  ;;  %v2607_v23 = vld [vmem:[#allocation4 + $0xc0] sm:$0xff]  }
  0xac   :  { %1361 = vmatpush1.bf16.msra.mxu0 %v2510_v19  ;;  %1533 = vmatpush1.bf16.msra.mxu1 %v2513_v20  ;;  %v67_v19 = vpack.c.bf16 %v60_v16, %v53_v15  ;;  %v2600_v20 = vld [vmem:[#allocation2 + $0x600] ss:$16 sps:$4 sm:$0xff]  }
  0xad   :  { %1362 = vmatprep.subr.bf16.mxu0 %v2518_v22  ;;  %1534 = vmatprep.subr.bf16.mxu1 %v2521_v24  ;;  %v2606_v22 = vld [vmem:[#allocation4 + $0x40] sm:$0xff]   ;;  %v2692_v24 = vmov 0  }
  0xb0   :  { %1363 = vmatpush1.bf16.msra.mxu0 %v2516_v25  ;;  %1535 = vmatpush1.bf16.msra.mxu1 %v2519_v26  ;;  %v55_v25 = vld [vmem:[%s2798_s0 + $0x30] sm:$0xff]  ;;  %v62_v26 = vld [vmem:[%s2798_s0 + $0x68] sm:$0xff] }
  0xb1   :  { %1364 = vmatprep.subr.bf16.mxu0 %v2524_v27  ;;  %1536 = vmatprep.subr.bf16.mxu1 %v2527_v28  ;;  %v69_v27 = vpack.c.bf16 %v62_v26, %v55_v25  ;;  %v2608_v28 = vld [vmem:[#allocation4] sm:$0xff]  }
  0xb4   :  { %1365 = vmatpush1.bf16.msra.mxu0 %v2522_v29  ;;  %1537 = vmatpush1.bf16.msra.mxu1 %v2525_v30  ;;  %v2609_v29 = vld [vmem:[#allocation4 + $0x80] sm:$0xff]   ;;  %v2610_v30 = vld [vmem:[#allocation4 + $0x48] sm:$0xff]  }
  0xb5   :  { %1366 = vmatprep.subr.bf16.mxu0 %v2530_v31  ;;  %1538 = vmatprep.subr.bf16.mxu1 %v2533_v32  ;;  %v2611_v31 = vld [vmem:[#allocation4 + $0xc8] sm:$0xff]  }
  0xb6   :  { %v2612_v32 = vld [vmem:[#allocation4 + $0x8] sm:$0xff]  }
  0xb8   :  { %1367 = vmatpush1.bf16.msra.mxu0 %v2528_v33  ;;  %1539 = vmatpush1.bf16.msra.mxu1 %v2531_v34  ;;  %v2613_v33 = vld [vmem:[#allocation4 + $0x88] sm:$0xff]   ;;  %v2614_v34 = vld [vmem:[#allocation4 + $0x50] sm:$0xff]  }
  0xb9   :  { %1368 = vmatprep.subr.bf16.mxu0 %v2536_v35  ;;  %1540 = vmatprep.subr.bf16.mxu1 %v2539_v36  ;;  %v2615_v35 = vld [vmem:[#allocation4 + $0xd0] sm:$0xff]  }
  0xba   :  { %v2616_v36 = vld [vmem:[#allocation4 + $0x10] sm:$0xff]  }
  0xbc   :  { %1369 = vmatpush1.bf16.msra.mxu0 %v2534_v37  ;;  %1541 = vmatpush1.bf16.msra.mxu1 %v2537_v38  ;;  %v2617_v37 = vld [vmem:[#allocation4 + $0x90] sm:$0xff]   ;;  %v2618_v38 = vld [vmem:[#allocation4 + $0x58] sm:$0xff]  }
  0xbd   :  { %1370 = vmatprep.subr.bf16.mxu0 %v2542_v39  ;;  %1542 = vmatprep.subr.bf16.mxu1 %v2545_v40  ;;  %v2619_v39 = vld [vmem:[#allocation4 + $0xd8] sm:$0xff]  }
  0xbe   :  { %v2620_v40 = vld [vmem:[#allocation4 + $0x18] sm:$0xff]  }
  0xc0   :  { %1371 = vmatpush1.bf16.msra.mxu0 %v2540_v41  ;;  %1543 = vmatpush1.bf16.msra.mxu1 %v2543_v42  ;;  %v2621_v41 = vld [vmem:[#allocation4 + $0x98] sm:$0xff]   ;;  %v2622_v42 = vld [vmem:[#allocation4 + $0x60] sm:$0xff]  }
  0xc1   :  { %1372 = vmatprep.subr.bf16.mxu0 %v2548_v43  ;;  %1544 = vmatprep.subr.bf16.mxu1 %v2551_v44  ;;  %v2623_v43 = vld [vmem:[#allocation4 + $0xe0] sm:$0xff]  }
  0xc2   :  { %v2624_v44 = vld [vmem:[#allocation4 + $0x20] sm:$0xff]  }
  0xc4   :  { %1373 = vmatpush1.bf16.msra.mxu0 %v2546_v45  ;;  %1545 = vmatpush1.bf16.msra.mxu1 %v2549_v46  ;;  %v2625_v45 = vld [vmem:[#allocation4 + $0xa0] sm:$0xff]   ;;  %v2626_v46 = vld [vmem:[#allocation4 + $0x68] sm:$0xff]  }
  0xc5   :  { %1374 = vmatprep.subr.bf16.mxu0 %v2554_v47  ;;  %1546 = vmatprep.subr.bf16.mxu1 %v2557_v48  ;;  %v2627_v47 = vld [vmem:[#allocation4 + $0xe8] sm:$0xff]  }
  0xc6   :  { %v2628_v48 = vld [vmem:[#allocation4 + $0x28] sm:$0xff]  }
  0xc8   :  { %1375 = vmatpush1.bf16.msra.mxu0 %v2552_v49  ;;  %1547 = vmatpush1.bf16.msra.mxu1 %v2555_v50  ;;  %v2629_v49 = vld [vmem:[#allocation4 + $0xa8] sm:$0xff]   ;;  %v2630_v50 = vld [vmem:[#allocation4 + $0x70] sm:$0xff]  }
  0xc9   :  { %1376 = vmatprep.subr.bf16.mxu0 %v2560_v51  ;;  %1548 = vmatprep.subr.bf16.mxu1 %v2563_v52  ;;  %v2631_v51 = vld [vmem:[#allocation4 + $0xf0] sm:$0xff]  }
  0xca   :  { %v2632_v52 = vld [vmem:[#allocation4 + $0x30] sm:$0xff]  }
  0xcc   :  { %1377 = vmatpush1.bf16.msra.mxu0 %v2558_v53  ;;  %1549 = vmatpush1.bf16.msra.mxu1 %v2561_v54  ;;  %v2633_v53 = vld [vmem:[#allocation4 + $0xb0] sm:$0xff]   ;;  %v2634_v54 = vld [vmem:[#allocation4 + $0x78] sm:$0xff]  }
  0xcd   :  { %1378 = vmatprep.subr.bf16.mxu0 %v2566_v55  ;;  %1550 = vmatprep.subr.bf16.mxu1 %v2569_v56  ;;  %v2635_v55 = vld [vmem:[#allocation4 + $0xf8] sm:$0xff]  }
  0xce   :  { %v2636_v56 = vld [vmem:[#allocation4 + $0x38] sm:$0xff]  }
  0xd0   :  { %1379 = vmatpush1.bf16.msra.mxu0 %v2564_v57  ;;  %1551 = vmatpush1.bf16.msra.mxu1 %v2567_v58  ;;  %v2637_v57 = vld [vmem:[#allocation4 + $0xb8] sm:$0xff]   ;;  %v268_v58 = vlaneseq }
  0xd1   :  { %1380 = vmatprep.subr.bf16.mxu0 %v2572_v59  ;;  %1552 = vmatprep.subr.bf16.mxu1 %v2575_v60 }
  0xd2   :  { %v269_v59 = vshrl.u32 %v268_v58, 7 }
  0xd4   :  { %1381 = vmatpush1.bf16.msra.mxu0 %v2570_v61  ;;  %1553 = vmatpush1.bf16.msra.mxu1 %v2573_v62  ;;  %v270_v60 = vsub.s32 0, %v269_v59  ;;  %v278_v61 = vsub.s32 2, %v269_v59  ;;  %v266_v62 = vld [vmem:[%s2800_s2] sm:$0xf] }
  0xd5   :  { %1382 = vmatprep.subr.bf16.mxu0 %v2578_v63  ;;  %1554 = vmatprep.subr.bf16.mxu1 %v2581_v0  ;;  %v274_v63 = vsub.s32 1, %v269_v59  ;;  %v282_v0 = vsub.s32 3, %v269_v59 }
  0xd8   :  { %1383 = vmatpush1.bf16.msra.mxu0 %v2576_v1  ;;  %1555 = vmatpush1.bf16.msra.mxu1 %v2579_v2  ;;  %v271_v1 = vrot.slane %v266_v62, %v270_v60  ;;  %v279_v2 = vrot.slane %v266_v62, %v278_v61 }
  0xd9   :  { %1384 = vmatprep.subr.bf16.mxu0 %v2584_v3  ;;  %1556 = vmatprep.subr.bf16.mxu1 %v2587_v4  ;;  %v275_v3 = vrot.slane %v266_v62, %v274_v63  ;;  %v283_v4 = vrot.slane %v266_v62, %v282_v0 }
  0xdc   :  { %1385 = vmatpush1.bf16.msra.mxu0 %v2582_v5  ;;  %1557 = vmatpush1.bf16.msra.mxu1 %v2585_v6 }
  0xdd   :  { %1386 = vmatprep.subr.bf16.mxu0 %v2590_v7  ;;  %1558 = vmatprep.subr.bf16.mxu1 %v2593_v8 }
  0xe0   :  { %1387 = vmatpush1.bf16.msra.mxu0 %v2588_v9  ;;  %1559 = vmatpush1.bf16.msra.mxu1 %v2591_v10 }
  0xe1   :  { %1388 = vmatprep.subr.bf16.mxu0 %v2596_v11  ;;  %1560 = vmatprep.subr.bf16.mxu1 %v2599_v12 }
  0xe4   :  { %1389 = vmatpush1.bf16.msra.mxu0 %v2594_v13  ;;  %1561 = vmatpush1.bf16.msra.mxu1 %v2597_v14 }
  0xe5   :  { %1401 = vmatprep.subr.bf16.mxu0 %v2602_v17  ;;  %1573 = vmatprep.subr.bf16.mxu1 %v2605_v18 }
  0xe7   :  { %1391 = vmatmul.mubr.bf16.vlgmr.msra.gmra.mrb[0].mxu0 %v67_v19  ;;  %1563 = vmatmul.mubr.bf16.vlgmr.msra.gmra.mrb[0].mxu1 %v67_v19 }
  0xe8   :  { %1402 = vmatpush1.bf16.msra.mxu0 %v2600_v20  ;;  %1574 = vmatpush1.bf16.msra.mxu1 %v2603_v21 }
  0xe9   :  { %1433 = vmatprep.mubr.bf16.mxu0 %v2692_v24  ;;  %1605 = vmatprep.mubr.bf16.mxu1 %v2692_v24 }
  0xea   :  { %2229 = vmatprep.subr.bf16.mxu0 %v2606_v22  ;;  %2251 = vmatprep.subr.bf16.mxu1 %v2607_v23 }
  0xf3   :  { %2185 = vmatmul.mubr.msk.bf16.vlgmr.msra.gmra.mrb[0].mxu0 %vm1268_vm0, %v69_v27  ;;  %2186 = vmatmul.mubr.msk.bf16.vlgmr.msra.gmra.mrb[0].mxu1 %vm1268_vm0, %v69_v27 }
  0xf4   :  { %2230 = vmatpush3.bf16.msra.mxu0 %v2608_v28  ;;  %2252 = vmatpush3.bf16.msra.mxu1 %v2609_v29 }
  0xf5   :  { %2231 = vmatprep.subr.bf16.mxu0 %v2610_v30  ;;  %2253 = vmatprep.subr.bf16.mxu1 %v2611_v31 }
  0xf8   :  { %2232 = vmatpush3.bf16.msra.mxu0 %v2612_v32  ;;  %2254 = vmatpush3.bf16.msra.mxu1 %v2613_v33 }
  0xf9   :  { %2233 = vmatprep.subr.bf16.mxu0 %v2614_v34  ;;  %2255 = vmatprep.subr.bf16.mxu1 %v2615_v35  ;;  %v2187_v35 = vld [vmem:[%s2802_s4] ss:$0 sm:$0xff] }
  0xfc   :  { %2234 = vmatpush3.bf16.msra.mxu0 %v2616_v36  ;;  %2256 = vmatpush3.bf16.msra.mxu1 %v2617_v37 }
  0xfd   :  { %2235 = vmatprep.subr.bf16.mxu0 %v2618_v38  ;;  %2257 = vmatprep.subr.bf16.mxu1 %v2619_v39 }
 0x100   :  { %2236 = vmatpush3.bf16.msra.mxu0 %v2620_v40  ;;  %2258 = vmatpush3.bf16.msra.mxu1 %v2621_v41 }
 0x101   :  { %2237 = vmatprep.subr.bf16.mxu0 %v2622_v42  ;;  %2259 = vmatprep.subr.bf16.mxu1 %v2623_v43 }
 0x104   :  { %2238 = vmatpush3.bf16.msra.mxu0 %v2624_v44  ;;  %2260 = vmatpush3.bf16.msra.mxu1 %v2625_v45 }
 0x105   :  { %2239 = vmatprep.subr.bf16.mxu0 %v2626_v46  ;;  %2261 = vmatprep.subr.bf16.mxu1 %v2627_v47 }
 0x108   :  { %2240 = vmatpush3.bf16.msra.mxu0 %v2628_v48  ;;  %2262 = vmatpush3.bf16.msra.mxu1 %v2629_v49 }
 0x109   :  { %2241 = vmatprep.subr.bf16.mxu0 %v2630_v50  ;;  %2263 = vmatprep.subr.bf16.mxu1 %v2631_v51 }
 0x10c   :  { %2242 = vmatpush3.bf16.msra.mxu0 %v2632_v52  ;;  %2264 = vmatpush3.bf16.msra.mxu1 %v2633_v53 }
 0x10d   :  { %2243 = vmatprep.subr.bf16.mxu0 %v2634_v54  ;;  %2265 = vmatprep.subr.bf16.mxu1 %v2635_v55 }
 0x110   :  { %2244 = vmatpush3.bf16.msra.mxu0 %v2636_v56  ;;  %2266 = vmatpush3.bf16.msra.mxu1 %v2637_v57 }
 0x1c6   :  { %v1435_v5 = vpop.f32.mrb[0].mxu0  ;;  %v1607_v6 = vpop.f32.mrb[0].mxu1 }
 0x1c7   :  { %v2273_v7 = vadd.f32 %v1435_v5, %v271_v1  ;;  %v2277_v8 = vadd.f32 %v1607_v6, %v279_v2  ;;  %v1437_v9 = vpop.f32.mrb[1].mxu0  ;;  %v1609_v10 = vpop.f32.mrb[1].mxu1 }
 0x1c8   :  { %v2274_v11 = vadd.f32 %v1437_v9, %v275_v3  ;;  %v2278_v12 = vadd.f32 %v1609_v10, %v283_v4  ;;  %v1439_v13 = vpop.f32.mrb[2].mxu0  ;;  %v1611_v14 = vpop.f32.mrb[2].mxu1 }
 0x1c9   :  { %v2275_v15 = vadd.f32 %v1439_v13, %v271_v1  ;;  %v2279_v16 = vadd.f32 %v1611_v14, %v279_v2  ;;  %v1441_v17 = vpop.f32.mrb[3].mxu0  ;;  %v1613_v18 = vpop.f32.mrb[3].mxu1  ;;  %v1616_v21 = vmax.f32 %v2273_v7, 0.0  ;;  %v1618_v22 = vmax.f32 %v2277_v8, 0.0 }
 0x1ca   :  { %v2276_v19 = vadd.f32 %v1441_v17, %v275_v3  ;;  %v2280_v20 = vadd.f32 %v1613_v18, %v283_v4  ;;  %v1617_v25 = vmax.f32 %v2274_v11, 0.0  ;;  %v1619_v26 = vmax.f32 %v2278_v12, 0.0 }
 0x1cb   :  { %v1620_v23 = vmax.f32 %v2275_v15, 0.0  ;;  %v1622_v24 = vmax.f32 %v2279_v16, 0.0 }
 0x1cc   :  { %v1621_v27 = vmax.f32 %v2276_v19, 0.0  ;;  %v1623_v28 = vmax.f32 %v2280_v20, 0.0 }
 0x1cd   :  { %v1624_v29 = vpack.c.bf16 %v1620_v23, %v1616_v21  ;;  %v1626_v30 = vpack.c.bf16 %v1622_v24, %v1618_v22 }
 0x1ce   :  { %v1625_v31 = vpack.c.bf16 %v1621_v27, %v1617_v25  ;;  %v1627_v32 = vpack.c.bf16 %v1623_v28, %v1619_v26 }
 0x1d0   :  { %1923 = vmatprep.mubr.bf16.mxu0 %v1625_v31  ;;  %1964 = vmatprep.mubr.bf16.mxu1 %v1627_v32 }
 0x1d1   :  { %1924 = vmatmul.mubr.bf16.vlgmr.msra.gmra.mrb[4].mxu0 %v1624_v29  ;;  %1965 = vmatmul.mubr.bf16.vlgmr.msra.gmra.mrb[4].mxu1 %v1626_v30 }
 0x2a4   :  { %v2245_v33 = vpop.f32.mrb[4].mxu0  ;;  %v2267_v34 = vpop.f32.mrb[4].mxu1 }
 0x2a5   :  { %v2246_v36 = vpop.f32.mrb[5].mxu0  ;;  %v2268_v37 = vpop.f32.mrb[5].mxu1 }
 0x2a6   :  { %v2247_v38 = vadd.f32 %v2246_v36, %v2245_v33  ;;  %v2269_v39 = vadd.f32 %v2268_v37, %v2267_v34  ;;  %v2248_v40 = vpop.f32.mrb[6].mxu0  ;;  %v2270_v41 = vpop.f32.mrb[6].mxu1 }
 0x2a7   :  { %v2249_v42 = vpop.f32.mrb[7].mxu0  ;;  %v2271_v43 = vpop.f32.mrb[7].mxu1 }
 0x2a8   :  { %v1926_v44 = vadd.f32 %v2247_v38, %v2187_v35  ;;  %v2250_v45 = vadd.f32 %v2249_v42, %v2248_v40  ;;  %v2272_v46 = vadd.f32 %v2271_v43, %v2270_v41 }
 0x2aa   :  { %v1967_v47 = vadd.f32 %v2269_v39, %v1926_v44  ;;  %v1929_v48 = vadd.f32 %v2250_v45, %v2187_v35 }
 0x2ac   :  { %v1970_v49 = vadd.f32 %v2272_v46, %v1929_v48 }
 0x2ae   :  { %v2227_v50 = vpack.c.bf16 %v1970_v49, %v1967_v47 }
 0x2b0   :  { %2228 = vst [vmem:[%s2803_s5] sm:$0xff] %v2227_v50  }
 0x2b1   :  { %1987 = vsyncpa [#allocation3], 1 }
 0x2b2   :  { %1988 = vsyncpa [#allocation5], 1 }

</bundles_post_ra>
